<compile_context>
chip_gen: v7x
topology: tpu7x:2x2x1
jax: 0.10.0
libtpu: 0.0.40
codegen_flags: <defaults>
</compile_context>

<pallas_src>
import jax
import jax.numpy as jnp
from jax.experimental import pallas as pl
from jax.experimental.pallas import tpu as pltpu

_LANE = 128


def _vmem_capacity_bytes() -> int:
    """Physical VMEM of the attached TPU; conservative 64 MiB fallback."""
    try:
        return int(pltpu.get_tpu_info().vmem_capacity_bytes)
    except Exception:
        return 64 * 1024 * 1024


def _nonoise_kernel(x_ref, h_ref, b_ref, o_ref):
    """One (m, k) grid step of y = x @ Hs^T + b (affine map pre-folded into Hs, b)."""
    k = pl.program_id(1)
    nk = pl.num_programs(1)

    @pl.when(k == 0)
    def _():
        o_ref[...] = jnp.zeros_like(o_ref)

    # x is the whole (B, N) array, resident in VMEM (constant index map);
    # pick out the K chunk matching this H tile.
    tk = h_ref.shape[0]
    if tk == x_ref.shape[1]:
        x_chunk = x_ref[...]
    else:
        start = pl.multiple_of(k * tk, _LANE)
        x_chunk = x_ref[:, pl.ds(start, tk)]

    # Canonical (B, K) x (K, M) contraction on the MXU, f32 accumulation in
    # the output block itself.
    o_ref[...] += jnp.dot(x_chunk, h_ref[...], preferred_element_type=jnp.float32)

    @pl.when(k == nk - 1)
    def _():
        o_ref[...] += b_ref[...]  # f32 bias, added once


def prepare_measurement_matrix(H: jax.Array, dtype=jnp.bfloat16):
    """One-time setup (analogue of constructing the Linear meas_op).

    Folds the NoNoise affine map into the operator:
        y = 0.5 * (1 + x) @ H^T  ==  x @ (0.5*H)^T + 0.5*sum_n H[:, n]
    pads M up to a multiple of 128 (lane-dense output / H stream), stores the
    scaled matrix pre-transposed as (N, M_pad), and casts it to `dtype`
    (default bf16 — exact for +/-1 / 0-1 spyrit patterns, halves HBM traffic).
    The bias stays in f32. Do this ONCE, outside the per-call hot path.

    Returns (HsT, bias, M_original) with HsT: (N, M_pad), bias: (1, M_pad).
    """
    H = jnp.asarray(H, jnp.float32)
    M, N = H.shape
    m_pad = pl.cdiv(M, _LANE) * _LANE
    Hs = 0.5 * H
    b = 0.5 * jnp.sum(H, axis=1)
    if m_pad != M:
        Hs = jnp.pad(Hs, ((0, m_pad - M), (0, 0)))
        b = jnp.pad(b, (0, m_pad - M))
    HsT = jnp.transpose(Hs).astype(dtype)          # (N, M_pad), canonical layout
    bias = b.reshape(1, m_pad).astype(jnp.float32)  # exact f32 bias
    return HsT, bias, M


def _pick_tm(m_pad: int, two_cores: bool) -> int:
    """M tile: keep >=2 blocks on 2-TC parts; bigger tiles on single-TC parts."""
    if two_cores:
        for tm in (256, 128):
            if m_pad % tm == 0 and m_pad // tm >= 2:
                return tm
        # Single 128-row tile: one TC idles. With B >= 16 a parallel B-tile
        # axis would recover it; not needed at the module's shapes.
        return min(128, m_pad)
    for tm in (512, 256, 128):
        if m_pad % tm == 0:
            return tm
    return min(128, m_pad)


def _pick_tk(B: int, tm: int, N: int, x_bytes: int, h_bytes: int, budget: int) -> int:
    """Largest K tile (divides N) whose buffers fit the VMEM tile budget."""
    # resident x (counted double-buffered, conservatively) + out + bias blocks
    fixed = 2 * B * N * x_bytes + 2 * B * tm * 4 + 2 * tm * 4
    if fixed + 2 * N * tm * h_bytes <= budget:
        return N  # whole contraction in one grid step (no K tiling)
    avail = budget - fixed
    if avail <= 0:
        tk = _LANE
    else:
        tk = max(_LANE, (avail // (2 * tm * h_bytes)) // _LANE * _LANE)
    tk = min(tk, N)
    # largest 128-multiple <= tk that divides N
    while tk >= _LANE:
        if N % tk == 0:
            return tk
        tk -= _LANE
    # no 128-multiple divisor of N: fall back to streaming whole rows
    return N


def nonoise_forward(x: jax.Array, HsT: jax.Array, bias: jax.Array, M: int) -> jax.Array:
    """NoNoise forward: y = 0.5*(1+x) @ H^T, with the affine map pre-folded.

    Args:
      x:    (B, N) batch of flattened images in [-1, 1].
      HsT:  (N, M_pad) pre-scaled, pre-transposed operator from
            `prepare_measurement_matrix` (M_pad multiple of 128).
      bias: (1, M_pad) f32 bias from `prepare_measurement_matrix`.
      M:    original number of measurements (output sliced back to M).
    Returns:
      (B, M) float32 measurements.
    """
    B, N = x.shape
    N_h, m_pad = HsT.shape
    assert N == N_h, "operator columns must match image size N"
    assert m_pad % _LANE == 0 and bias.shape == (1, m_pad), (
        "use prepare_measurement_matrix() to build HsT / bias")

    # One-time cast (tiny) so the inner loop is MXU/DMA-only with matching dtypes.
    if x.dtype != HsT.dtype:
        x = x.astype(HsT.dtype)

    # Generation-aware VMEM budgeting.
    cap = _vmem_capacity_bytes()
    two_cores = cap < 100 * 1024 * 1024          # 64 MiB VMEM parts (v7x, 2 TCs)
    tile_budget = (12 << 20) if two_cores else (32 << 20)
    vmem_limit = (32 << 20) if two_cores else (96 << 20)

    tm = _pick_tm(m_pad, two_cores)
    tk = _pick_tk(B, tm, N, x.dtype.itemsize, HsT.dtype.itemsize, tile_budget)

    n_m = m_pad // tm
    n_k = N // tk if N % tk == 0 else 1

    y_pad = pl.pallas_call(
        _nonoise_kernel,
        out_shape=jax.ShapeDtypeStruct((B, m_pad), jnp.float32),
        grid_spec=pltpu.PrefetchScalarGridSpec(
            num_scalar_prefetch=0,
            grid=(n_m, n_k),  # reduction axis (K) last
            in_specs=[
                # x: whole array, constant block index -> DMA'd once, VMEM-resident.
                pl.BlockSpec((B, N), lambda m, k: (0, 0)),
                # Hs^T tile in canonical (K, M) layout.
                pl.BlockSpec((tk, tm), lambda m, k: (k, m)),
                # f32 bias tile.
                pl.BlockSpec((1, tm), lambda m, k: (0, m)),
            ],
            # Output block is resident across K and used directly as the f32
            # accumulator (no extra scratch, no finalize copy).
            out_specs=pl.BlockSpec((B, tm), lambda m, k: (0, m)),
        ),
        compiler_params=pltpu.CompilerParams(
            dimension_semantics=("parallel", "arbitrary"),
            vmem_limit_bytes=vmem_limit,
        ),
    )(x, HsT, bias)

    return y_pad[:, :M] if M != m_pad else y_pad


if __name__ == "__main__":
    # Shapes consistent with the module docstring (H: [400, 32*32]), small batch.
    B, N, M = 8, 32 * 32, 400

    key = jax.random.PRNGKey(0)
    kx, kh = jax.random.split(key)
    x = jax.random.uniform(kx, (B, N), jnp.float32, minval=-1.0, maxval=1.0)
    H = jax.random.uniform(kh, (M, N), jnp.float32)

    # Reference in plain JAX.
    y_ref = ((x + 1.0) * 0.5) @ H.T

    # f32 operator path: bit-accurate check.
    HsT32, b32, M32 = prepare_measurement_matrix(H, dtype=jnp.float32)
    y32 = jax.block_until_ready(nonoise_forward(x, HsT32, b32, M32))
    assert y32.shape == (B, M)
    assert jnp.allclose(y32, y_ref, rtol=1e-5, atol=1e-4), "f32 path mismatch"

    # Default bf16 operator path: halves H streaming (exact for +/-1 patterns);
    # loose tolerance here because this H is dense random.
    HsT16, b16, M16 = prepare_measurement_matrix(H)
    y16 = jax.block_until_ready(nonoise_forward(x, HsT16, b16, M16))
    assert y16.shape == (B, M)
    assert jnp.allclose(y16, y_ref, rtol=2e-2, atol=2e-1), "bf16 path mismatch"

    print("KERNEL_OK")
</pallas_src>

<mosaic_0001>
module attributes {stable_mosaic.version = 11 : i64} {
  func.func @_nonoise_kernel(%arg0: i32, %arg1: i32, %arg2: memref<8x1024xf32, #tpu.memory_space<vmem>>, %arg3: memref<1024x256xf32, #tpu.memory_space<vmem>>, %arg4: memref<1x256xf32, #tpu.memory_space<vmem>>, %arg5: memref<8x256xf32, #tpu.memory_space<vmem>>) attributes {dimension_semantics = [#tpu.dimension_semantics<parallel>, #tpu.dimension_semantics<arbitrary>], iteration_bounds = array<i64: 2, 1>, scalar_prefetch = 0 : i64, scratch_operands = 0 : i64, tpu.core_type = #tpu.core_type<tc>, window_params = [{pipeline_mode = #tpu.pipeline_mode<synchronous>, transform_indices = @transform_0, window_bounds = array<i64: 8, 1024>}, {transform_indices = @transform_1, window_bounds = array<i64: 1024, 256>}, {transform_indices = @transform_2, window_bounds = array<i64: 1, 256>}, {transform_indices = @transform_3, window_bounds = array<i64: 8, 256>}]} {
    %c0_i32 = arith.constant 0 : i32
    %0 = arith.cmpi eq, %arg1, %c0_i32 : i32
    %1 = arith.extui %0 : i1 to i32
    %c0_i32_0 = arith.constant 0 : i32
    %2 = arith.cmpi ne, %1, %c0_i32_0 : i32
    scf.if %2 {
      %cst_10 = arith.constant 0.000000e+00 : f32
      %12 = vector.broadcast %cst_10 : f32 to vector<8x256xf32>
      %c0_11 = arith.constant 0 : index
      %c0_12 = arith.constant 0 : index
      %13 = vector.load %arg5[%c0_11, %c0_12] : memref<8x256xf32, #tpu.memory_space<vmem>>, vector<8x256xf32>
      tpu.vector_store %arg5[%c0_11, %c0_12], %12 {strides = array<i32>} : memref<8x256xf32, #tpu.memory_space<vmem>>, vector<8x256xf32>,
    } else {
    }
    %c0 = arith.constant 0 : index
    %c0_1 = arith.constant 0 : index
    %3 = vector.load %arg2[%c0, %c0_1] : memref<8x1024xf32, #tpu.memory_space<vmem>>, vector<8x1024xf32>
    %c0_2 = arith.constant 0 : index
    %c0_3 = arith.constant 0 : index
    %4 = vector.load %arg5[%c0_2, %c0_3] : memref<8x256xf32, #tpu.memory_space<vmem>>, vector<8x256xf32>
    %c0_4 = arith.constant 0 : index
    %c0_5 = arith.constant 0 : index
    %5 = vector.load %arg3[%c0_4, %c0_5] : memref<1024x256xf32, #tpu.memory_space<vmem>>, vector<1024x256xf32>
    %cst = arith.constant dense<0.000000e+00> : vector<8x256xf32>
    %6 = tpu.matmul %3, %5, %cst {dimension_numbers = #tpu.dot_dimension_numbers<[1], [0], [0], [1], [0, 0, 1, 1], [], []>} : vector<8x1024xf32>, vector<1024x256xf32>, vector<8x256xf32> -> vector<8x256xf32>
    %7 = arith.addf %4, %6 : vector<8x256xf32>
    %c0_6 = arith.constant 0 : index
    %c0_7 = arith.constant 0 : index
    %8 = vector.load %arg5[%c0_6, %c0_7] : memref<8x256xf32, #tpu.memory_space<vmem>>, vector<8x256xf32>
    tpu.vector_store %arg5[%c0_6, %c0_7], %7 {strides = array<i32>} : memref<8x256xf32, #tpu.memory_space<vmem>>, vector<8x256xf32>,
    %c0_i32_8 = arith.constant 0 : i32
    %9 = arith.cmpi eq, %arg1, %c0_i32_8 : i32
    %10 = arith.extui %9 : i1 to i32
    %c0_i32_9 = arith.constant 0 : i32
    %11 = arith.cmpi ne, %10, %c0_i32_9 : i32
    scf.if %11 {
      %c0_10 = arith.constant 0 : index
      %c0_11 = arith.constant 0 : index
      %12 = vector.load %arg5[%c0_10, %c0_11] : memref<8x256xf32, #tpu.memory_space<vmem>>, vector<8x256xf32>
      %c0_12 = arith.constant 0 : index
      %c0_13 = arith.constant 0 : index
      %13 = vector.load %arg4[%c0_12, %c0_13] : memref<1x256xf32, #tpu.memory_space<vmem>>, vector<1x256xf32>
      %14 = vector.broadcast %13 : vector<1x256xf32> to vector<8x256xf32>
      %15 = arith.addf %12, %14 : vector<8x256xf32>
      %c0_14 = arith.constant 0 : index
      %c0_15 = arith.constant 0 : index
      %16 = vector.load %arg5[%c0_14, %c0_15] : memref<8x256xf32, #tpu.memory_space<vmem>>, vector<8x256xf32>
      tpu.vector_store %arg5[%c0_14, %c0_15], %15 {strides = array<i32>} : memref<8x256xf32, #tpu.memory_space<vmem>>, vector<8x256xf32>,
    } else {
    }
    return
  }
  func.func @transform_0(%arg0: i32, %arg1: i32) -> (i32, i32) {
    %c0_i32 = arith.constant 0 : i32
    %c0_i32_0 = arith.constant 0 : i32
    %c0_i32_1 = arith.constant 0 : i32
    return %c0_i32, %c0_i32_0 : i32, i32
  }
  func.func @transform_1(%arg0: i32, %arg1: i32) -> (i32, i32) {
    %c0_i32 = arith.constant 0 : i32
    return %arg1, %arg0 : i32, i32
  }
  func.func @transform_2(%arg0: i32, %arg1: i32) -> (i32, i32) {
    %c0_i32 = arith.constant 0 : i32
    %c0_i32_0 = arith.constant 0 : i32
    return %c0_i32, %arg0 : i32, i32
  }
  func.func @transform_3(%arg0: i32, %arg1: i32) -> (i32, i32) {
    %c0_i32 = arith.constant 0 : i32
    %c0_i32_0 = arith.constant 0 : i32
    return %c0_i32, %arg0 : i32, i32
  }
}

</mosaic_0001>

<bundles_post_ra>
// kernel: tpu_custom_call.1
= control target key start
LH: loop header
LB: loop body
LE: loop exit
PB: predicated region body
PF: predicated region fallthrough
CT: control target
= control target key end

     0   :  { %s2047_s0 = inlined_call_operand.hbm [shape: f32[8,1024], index: 0, kind: input, shape index: {}]   ;;  %s2048_s1 = inlined_call_operand.hbm [shape: f32[1024,512], index: 1, kind: input, shape index: {}]   ;;  %s2049_s2 = inlined_call_operand.hbm [shape: f32[1,512], index: 2, kind: input, shape index: {}]   ;;  %s2050_s3 = inlined_call_operand.hbm [shape: f32[8,512], index: 3, kind: output, shape index: {}]  }
   0x1   :  { %2056 = sst [smem:[#allocation12_spill]] %s2048_s1 }
   0x2   :  { %8 = vsyncpa [#allocation3], 0 }
   0x3   :  { %9 = vsyncpa [#allocation6], 0 }
   0x4   :  { %11 = vsyncpa [#allocation6 + $0x1], 0 }
   0x5   :  { %12 = vsyncpa [#allocation4], 0 }
   0x6   :  { %14 = vsyncpa [#allocation4 + $0x1], 0  ;;  %s1538_s12 = smov 0   ;;  %s1540_s13 = smov 0  }
   0x7   :  { %s1542_s14 = smov 0   ;;  %s1544_s15 = smov 0  }
   0x8   :  { %s1546_s16 = smov 0   ;;  %s1548_s17 = smov 0  }
   0x9 LB: > { %s32_s18 = sadd.s32 1, %s1505_s16  ;;  %s62_s19 = sadd.s32 1, %s1497_s14  ;;  %s1509_s17 = sphi %s1548_s17, %s20_s17   ;;  %s1505_s16 = sphi %s1546_s16, %s2076_s16   ;;  %s1501_s15 = sphi %s1544_s15, %s2075_s15   ;;  %s1497_s14 = sphi %s1542_s14, %s2074_s14   ;;  %s1493_s13 = sphi %s1540_s13, %s2073_s13   ;;  %s1489_s12 = sphi %s1538_s12, %s2072_s12  }
   0xa   : > { %p34_p0 = scmp.ge.s32.totalorder %s32_s18, 2  ;;  %p69_p1 = scmp.ne.s32.totalorder %s1497_s14, %s1493_s13 }
   0xb   : > { %p70_p2 = scmp.eq.s32.totalorder %s1509_s17, 0  ;;  %p1279_p5 = scmp.lt.s32.totalorder %s1509_s17, 2 }
   0xc   : > { %s2078_s18 = smov (%p34_p0, %s32_s18), 0  ;;  %s162_s21 = sand.u32 1, %s1509_s17  }
   0xd   : > { %p71_p4 = por %p70_p2, %p69_p1  ;;  %s58_s20 = ssub.s32 %s1505_s16, %s2078_s18 }
   0xe   : > { %p60_p6 = scmp.eq.s32.totalorder %s58_s20, 0  ;;  %s164_s22 = sand.u32 1, %s1497_s14  }
   0xf   : > { %s988_s23 = sshll.u32 %s1505_s16, 8  ;;  %s972_s25 = sshll.u32 %s164_s22, 11 }
  0x10   : > { %s1586_s24 = scalar_select %p60_p6, %s1497_s14, %s62_s19  }
  0x11   : > { %s2057_s1 = sld [smem:[#allocation12_spill]]  ;;  %p1595_p7 = pnand %p1279_p5, %p71_p4 }
  0x12   : > { %s166_s30 = scalar_lea.vmem [#allocation5], %s972_s25  ;;  %s1601_s5 = scalar_lea.sflag [#allocation6], %s162_s21 }
  0x13   : > { %s176_s4 = sshll.u32 %s166_s30, 4  ;;  %p1337_p9 = pneg %p1595_p7  ;;  %s1599_s4 = int_to_ptr.vmem [resolvable:$true] %s176_s4 }
  0x17   : > { %s1593_s28 = scalar_lea.hbm %s2057_s1, %s988_s23  ;;  %s1340_s9 = scalar_lea.hbm %s2057_s1, 65536 }
  0x18   : > { %s1335_s6 = scalar_lea.hbm %s1593_s28, 32768  ;;  %p1341_p12 = scmp.lt.u32.totalorder %s1593_s28, %s2057_s1 }
  0x19   : > { %p1336_p8 = scmp.ne.s32.totalorder %s1593_s28, %s1335_s6  ;;  %p1342_p13 = scmp.lt.u32.totalorder %s1340_s9, %s1335_s6 }
  0x1a   : > { %p1344_p2 = scmp.lt.u32.totalorder %s1335_s6, %s1593_s28 }
  0x1b   : > { %p1338_p10 = pnand %p1337_p9, %p1336_p8  ;;  %p1343_p0 = por %p1342_p13, %p1341_p12 }
  0x1d   : > { %p1339_p11 = pneg %p1338_p10  ;;  %p1345_p4 = por %p1344_p2, %p1343_p0 }
  0x1f   : > { %p1346_p5 = pnand %p1345_p4, %p1339_p11 }
  0x21   : > { %1349 = shalt.err (!%p1346_p5)
}
  0x22   : > { %s1350_s19 = scalar_lea.vmem %s1599_s4, 32768  ;;  %s1511_s20 = smov [#allocation5]  }
  0x23   : > { %p1351_p6 = scmp.ne.s32.totalorder %s1599_s4, %s1350_s19  ;;  %s1355_s21 = sshll.u32 %s1511_s20, 4  ;;  %s1356_s21 = int_to_ptr.vmem [resolvable:$false] %s1355_s21 }
  0x24   : > { %s1357_s23 = scalar_lea.vmem %s1356_s21, 65536  ;;  %p1358_p3 = scmp.lt.s32.totalorder %s1599_s4, %s1356_s21 }
  0x25   : > { %p1353_p8 = pnand %p1351_p6, %p1337_p9  ;;  %p1359_p12 = scmp.lt.s32.totalorder %s1357_s23, %s1350_s19 }
  0x27   : > { %p1354_p10 = pneg %p1353_p8  ;;  %p1360_p13 = por %p1359_p12, %p1358_p3 }
  0x29   : > { %p1361_p0 = pnand %p1360_p13, %p1354_p10 }
  0x2b   : > { %1364 = shalt.err (!%p1361_p0)
}
  0x2c   : > { %s1512_s25 = smov 512   ;;  %s1513_s26 = smov 256  }
  0x2d   : > { %s1514_s27 = smov 16   ;;  %s1630_s30 = sadd.s32 4294967295, %s1509_s17  }
  0x2e   : > { %1270 = dma.hbm_to_vmem [thread:$0]  (!%p1595_p7), %s1593_s28, 32768, %s1599_s4, %s1601_s5, %s1512_s25, %s1513_s26, %s1514_s27  }
  0x2f   : > { %s968_s6 = sadd.s32 4294967294, %s1509_s17   ;;  %p75_p3 = scmp.ne.s32.totalorder %s1493_s13, %s1489_s12 }
  0x30   : > { %p2051_p11 = scmp.eq.s32.totalorder %s1630_s30, 0  ;;  %p125_p2 = scmp.eq.s32.totalorder %s1630_s30, 1 }
  0x31   : > { %p131_p4 = scmp.eq.s32.totalorder %s968_s6, 1  ;;  %p969_p6 = scmp.ge.s32.totalorder %s1509_s17, 1 }
  0x32   : > { %p1639_p5 = por %p2051_p11, %p75_p3  ;;  %p1647_p8 = por %p125_p2, %p69_p1 }
  0x33   : > { %p1651_p10 = por %p131_p4, %p75_p3  ;;  %p138_p12 = scmp.lt.s32.totalorder %s1509_s17, 3 }
  0x34   : > { %s2059_s7 = scalar_select %p1639_p5, 1, 0 }
  0x35   : > { %s2060_s28 = scalar_select %p1647_p8, 1, 0 }
  0x36   : > { %s2061_s4 = scalar_select %p1651_p10, 1, 0 }
  0x37   : > { %s975_s8 = sshll.u32 %s164_s22, 1  ;;  %p1658_p13 = pnand %p969_p6, %p138_p12 }
  0x38   : > { %s1515_s10 = smov [#allocation2]   ;;  %s989_s19 = sshll.u32 %s1505_s16, 5 }
  0x39   : > { %s2062_s9 = scalar_select %p1658_p13, 1, 0 }
  0x3a   : > { %s151_s11 = sshll.u32 %s1515_s10, 4  ;;  %p1263_p1 = pneg %p1658_p13  ;;  %s1662_s11 = int_to_ptr.vmem [resolvable:$true] %s151_s11 }
  0x3b   : > { %s1670_s23 = scalar_lea.hbm %s2049_s2, %s989_s19  ;;  %s190_s22 = scalar_lea.vmem [#allocation7], %s975_s8 }
  0x3c   : > { %s198_s25 = sshll.u32 %s190_s22, 4  ;;  %p1674_p0 = pnand %p1263_p1, %p2051_p11  ;;  %s199_s25 = int_to_ptr.vmem [resolvable:$true] %s198_s25 }
  0x3d   : > { %s1365_s27 = scalar_lea.hbm %s1670_s23, 32  ;;  %s1370_s19 = scalar_lea.hbm %s2049_s2, 64 }
  0x3e   : > { %s2063_s26 = scalar_select %p1674_p0, 1, 0 }
  0x3f   : > { %p1366_p3 = scmp.ne.s32.totalorder %s1670_s23, %s1365_s27  ;;  %p1371_p6 = scmp.lt.u32.totalorder %s1670_s23, %s2049_s2 }
  0x40   : > { %p1372_p12 = scmp.lt.u32.totalorder %s1370_s19, %s1365_s27  ;;  %p1374_p11 = scmp.lt.u32.totalorder %s1365_s27, %s1670_s23 }
  0x41   : > { %p1368_p2 = pnand %p1366_p3, %p1337_p9 }
  0x42   : > { %p1373_p1 = por %p1372_p12, %p1371_p6 }
  0x43   : > { %p1369_p4 = pneg %p1368_p2 }
  0x44   : > { %p1375_p10 = por %p1374_p11, %p1373_p1 }
  0x46   : > { %p1376_p8 = pnand %p1375_p10, %p1369_p4 }
  0x48   : > { %1379 = shalt.err (!%p1376_p8)
}
  0x49   : > { %s1380_s8 = scalar_lea.vmem %s199_s25, 32  ;;  %s1516_s22 = smov [#allocation7]  }
  0x4a   : > { %p1381_p5 = scmp.ne.s32.totalorder %s199_s25, %s1380_s8  ;;  %s1385_s6 = sshll.u32 %s1516_s22, 4  ;;  %s1386_s6 = int_to_ptr.vmem [resolvable:$false] %s1385_s6 }
  0x4b   : > { %s1387_s10 = scalar_lea.vmem %s1386_s6, 64  ;;  %p1388_p13 = scmp.lt.s32.totalorder %s199_s25, %s1386_s6 }
  0x4c   : > { %p1383_p3 = pnand %p1381_p5, %p1337_p9  ;;  %p1389_p0 = scmp.lt.s32.totalorder %s1387_s10, %s1380_s8 }
  0x4e   : > { %p1384_p2 = pneg %p1383_p3  ;;  %p1390_p6 = por %p1389_p0, %p1388_p13 }
  0x50   : > { %p1391_p12 = pnand %p1390_p6, %p1384_p2 }
  0x52   : > { %1394 = shalt.err (!%p1391_p12)
}
  0x53   : > { %1273 = dma.hbm_to_vmem [thread:$0]  (!%p1595_p7), %s1670_s23, 32, %s199_s25, %s1601_s5  }
  0x54   : > { %s1395_s20 = scalar_lea.hbm %s2047_s0, 1024  ;;  %p2064_p11 = scmp.ne.s32.totalorder %s2063_s26, 0 }
  0x55   : > { %p1396_p9 = scmp.ne.s32.totalorder %s2047_s0, %s1395_s20  ;;  %p1402_p13 = scmp.lt.u32.totalorder %s1395_s20, %s2047_s0 }
  0x56   : > { %p1397_p5 = pneg %p2064_p11 }
  0x58   : > { %p1398_p8 = pnand %p1397_p5, %p1396_p9 }
  0x5a   : > { %p1399_p10 = pneg %p1398_p8 }
  0x5c   : > { %p1404_p0 = pnand %p1402_p13, %p1399_p10 }
  0x5e   : > { %1407 = shalt.err (!%p1404_p0)
}
  0x5f   : > { %s1408_s29 = scalar_lea.vmem %s1662_s11, 1024  ;;  %p1416_p3 = scmp.lt.s32.totalorder %s1662_s11, %s1662_s11 }
  0x60   : > { %p1409_p7 = scmp.ne.s32.totalorder %s1662_s11, %s1408_s29  ;;  %p1417_p2 = scmp.lt.s32.totalorder %s1408_s29, %s1408_s29 }
  0x62   : > { %p1411_p4 = pnand %p1409_p7, %p1397_p5  ;;  %p1418_p6 = por %p1417_p2, %p1416_p3 }
  0x64   : > { %p1412_p1 = pneg %p1411_p4 }
  0x66   : > { %p1419_p12 = pnand %p1418_p6, %p1412_p1 }
  0x68   : > { %1422 = shalt.err (!%p1419_p12)
}
  0x69   : > { %1266 = dma.hbm_to_vmem [thread:$0]  (!%p2064_p11), %s2047_s0, 1024, %s1662_s11, [#allocation3]  }
  0x6a   : > { %p2065_p9 = scmp.ne.s32.totalorder %s2062_s9, 0 }
  0x6b   : > { %p2066_p8 = scmp.eq.s32.totalorder (!%p2065_p9), %s1630_s30, 0 }
  0x6c   : > { %207 = sbr.rel (%p2065_p9) target bundleno = 485 (0x1e5), region = 32 }
  0x73   : > { %1476 = dma.done.wait (%p2066_p8), [#allocation3], 1024   ;;  %p2067_p5 = pmov %p2066_p8 }
  0x74   : > { %s213_s23 = sand.u32 1, %s1630_s30   ;;  %s1727_s25 = sand.u32 1, %s1493_s13  }
  0x75   : > { %1478 = vsyncadd (%p2067_p5), [#allocation3], 4294966272  ;;  %s980_s26 = sshll.u32 %s1727_s25, 11  ;;  %s214_s6 = scalar_lea.sflag [#allocation6], %s213_s23 }
  0x76   : > { %s1730_s10 = scalar_lea.vmem [#allocation5], %s980_s26  ;;  %p2068_p11 = scmp.ne.s32.totalorder %s2059_s7, 0 }
  0x78   : > { %1480 = dma.done.wait (%p2068_p11), %s214_s6, 32800  }
  0x79   : > { %1482 = vsyncadd (%p2068_p11), %s214_s6, 4294934496  ;;  %v275_v0 = vld [vmem:[%s1730_s10 + $0x8] sm:$0xff]  ;;  %v277_v1 = vld [vmem:[%s1730_s10 + $0x18] sm:$0xff]  ;;  %s981_s30 = sshll.u32 %s1727_s25, 1  ;;  %s982_s7 = sshll.u32 %s1727_s25, 4 }
  0x7a   : > { %v403_v2 = vld [vmem:[%s1730_s10 + $0x408] sm:$0xff]  ;;  %v991_v3 = vpack.c.bf16 %v277_v1, %v275_v0  ;;  %v405_v4 = vld [vmem:[%s1730_s10 + $0x418] sm:$0xff]  ;;  %v274_v5 = vld [vmem:[%s1730_s10] sm:$0xff]  ;;  %s226_s9 = scalar_lea.vmem [#allocation7], %s981_s30  ;;  %s990_s11 = sshll.u32 %s1501_s15, 8 }
  0x7b   : > { %v276_v6 = vld [vmem:[%s1730_s10 + $0x10] sm:$0xff]  ;;  %v1119_v7 = vpack.c.bf16 %v405_v4, %v403_v2  ;;  %v402_v9 = vld [vmem:[%s1730_s10 + $0x400] sm:$0xff]  ;;  %v279_v11 = vld [vmem:[%s1730_s10 + $0x28] sm:$0xff]  ;;  %s253_s27 = scalar_lea.vmem [#allocation8], %s982_s7  ;;  %s1998_s8 = scalar_lea.hbm %s2050_s3, %s990_s11 }
  0x7c   : > { %v993_v8 = vpack.c.bf16 %v276_v6, %v274_v5  ;;  %v404_v10 = vld [vmem:[%s1730_s10 + $0x410] sm:$0xff]  ;;  %992 = vmatprep.subr.bf16.mxu1 %v991_v3  ;;  %v281_v13 = vld [vmem:[%s1730_s10 + $0x38] sm:$0xff]  ;;  %v407_v14 = vld [vmem:[%s1730_s10 + $0x428] sm:$0xff]  ;;  %s854_s19 = sshll.u32 %s253_s27, 4  ;;  %s840_s22 = scalar_lea.sflag [#allocation4], %s1727_s25  ;;  %s2000_s19 = int_to_ptr.vmem [resolvable:$true] %s854_s19 }
  0x7d   : > { %v1121_v12 = vpack.c.bf16 %v404_v10, %v402_v9  ;;  %v409_v15 = vld [vmem:[%s1730_s10 + $0x438] sm:$0xff]  ;;  %1120 = vmatprep.subr.bf16.mxu0 %v1119_v7  ;;  %v995_v16 = vpack.c.bf16 %v281_v13, %v279_v11  ;;  %v278_v18 = vld [vmem:[%s1730_s10 + $0x20] sm:$0xff]  ;;  %v280_v19 = vld [vmem:[%s1730_s10 + $0x30] sm:$0xff]  ;;  %s1423_s29 = scalar_lea.vmem %s2000_s19, 256  ;;  %p2069_p13 = scmp.ne.s32.totalorder %s2060_s28, 0 }
  0x7e   : > { %994 = vmatpush1.bf16.msra.mxu1 %v993_v8  ;;  %v1123_v17 = vpack.c.bf16 %v409_v15, %v407_v14  ;;  %v406_v20 = vld [vmem:[%s1730_s10 + $0x420] sm:$0xff]  ;;  %v997_v21 = vpack.c.bf16 %v280_v19, %v278_v18  ;;  %v408_v22 = vld [vmem:[%s1730_s10 + $0x430] sm:$0xff]  ;;  %v283_v23 = vld [vmem:[%s1730_s10 + $0x48] sm:$0xff]  ;;  %p1424_p10 = scmp.ne.s32.totalorder %s2000_s19, %s1423_s29  ;;  %s1517_s15 = smov [#allocation8]  }
  0x7f   : > { %1122 = vmatpush1.bf16.msra.mxu0 %v1121_v12  ;;  %v285_v24 = vld [vmem:[%s1730_s10 + $0x58] sm:$0xff]  ;;  %996 = vmatprep.subr.bf16.mxu1 %v995_v16  ;;  %v1125_v25 = vpack.c.bf16 %v408_v22, %v406_v20  ;;  %v411_v27 = vld [vmem:[%s1730_s10 + $0x448] sm:$0xff]  ;;  %v282_v29 = vld [vmem:[%s1730_s10 + $0x40] sm:$0xff]  ;;  %s1427_s1 = sshll.u32 %s1517_s15, 4  ;;  %s1428_s1 = int_to_ptr.vmem [resolvable:$false] %s1427_s1 }
  0x80   : > { %1124 = vmatprep.subr.bf16.mxu0 %v1123_v17  ;;  %v999_v26 = vpack.c.bf16 %v285_v24, %v283_v23  ;;  %v413_v28 = vld [vmem:[%s1730_s10 + $0x458] sm:$0xff]  ;;  %v284_v31 = vld [vmem:[%s1730_s10 + $0x50] sm:$0xff]  ;;  %v410_v32 = vld [vmem:[%s1730_s10 + $0x440] sm:$0xff]  ;;  %p1425_p0 = pnand %p1424_p10, %p2069_p13  ;;  %s1429_s5 = scalar_lea.vmem %s1428_s1, 512 }
  0x81   : > { %v1127_v30 = vpack.c.bf16 %v413_v28, %v411_v27  ;;  %v412_v33 = vld [vmem:[%s1730_s10 + $0x450] sm:$0xff]  ;;  %v1001_v34 = vpack.c.bf16 %v284_v31, %v282_v29  ;;  %v287_v35 = vld [vmem:[%s1730_s10 + $0x68] sm:$0xff]  ;;  %v289_v36 = vld [vmem:[%s1730_s10 + $0x78] sm:$0xff]  ;;  %p1430_p4 = scmp.lt.s32.totalorder %s2000_s19, %s1428_s1  ;;  %p1431_p1 = scmp.lt.s32.totalorder %s1429_s5, %s1423_s29 }
  0x82   : > { %998 = vmatpush1.bf16.msra.mxu1 %v997_v21  ;;  %v415_v37 = vld [vmem:[%s1730_s10 + $0x468] sm:$0xff]  ;;  %v1129_v38 = vpack.c.bf16 %v412_v33, %v410_v32  ;;  %v1003_v39 = vpack.c.bf16 %v289_v36, %v287_v35  ;;  %v417_v40 = vld [vmem:[%s1730_s10 + $0x478] sm:$0xff]  ;;  %v286_v41 = vld [vmem:[%s1730_s10 + $0x60] sm:$0xff]  ;;  %p1426_p7 = pneg %p1425_p0 }
  0x83   : > { %1126 = vmatpush1.bf16.msra.mxu0 %v1125_v25  ;;  %1000 = vmatprep.subr.bf16.mxu1 %v999_v26  ;;  %v288_v42 = vld [vmem:[%s1730_s10 + $0x70] sm:$0xff]  ;;  %v1131_v43 = vpack.c.bf16 %v417_v40, %v415_v37  ;;  %v414_v44 = vld [vmem:[%s1730_s10 + $0x460] sm:$0xff]  ;;  %v291_v46 = vld [vmem:[%s1730_s10 + $0x88] sm:$0xff]  ;;  %p1432_p3 = por %p1431_p1, %p1430_p4 }
  0x84   : > { %1128 = vmatprep.subr.bf16.mxu0 %v1127_v30  ;;  %v416_v45 = vld [vmem:[%s1730_s10 + $0x470] sm:$0xff]  ;;  %v293_v47 = vld [vmem:[%s1730_s10 + $0x98] sm:$0xff]  ;;  %v419_v48 = vld [vmem:[%s1730_s10 + $0x488] sm:$0xff]  ;;  %v1005_v50 = vpack.c.bf16 %v288_v42, %v286_v41 }
  0x85   : > { %v421_v49 = vld [vmem:[%s1730_s10 + $0x498] sm:$0xff]  ;;  %v1133_v51 = vpack.c.bf16 %v416_v45, %v414_v44  ;;  %v1007_v52 = vpack.c.bf16 %v293_v47, %v291_v46  ;;  %v290_v53 = vld [vmem:[%s1730_s10 + $0x80] sm:$0xff]  ;;  %v292_v54 = vld [vmem:[%s1730_s10 + $0x90] sm:$0xff]  ;;  %p1433_p2 = pnand %p1432_p3, %p1426_p7 }
  0x86   : > { %1002 = vmatpush1.bf16.msra.mxu1 %v1001_v34  ;;  %v418_v55 = vld [vmem:[%s1730_s10 + $0x480] sm:$0xff]  ;;  %v1135_v56 = vpack.c.bf16 %v421_v49, %v419_v48  ;;  %v420_v57 = vld [vmem:[%s1730_s10 + $0x490] sm:$0xff]  ;;  %v295_v58 = vld [vmem:[%s1730_s10 + $0xa8] sm:$0xff]  ;;  %v1009_v62 = vpack.c.bf16 %v292_v54, %v290_v53 }
  0x87   : > { %1130 = vmatpush1.bf16.msra.mxu0 %v1129_v38  ;;  %1004 = vmatprep.subr.bf16.mxu1 %v1003_v39  ;;  %v297_v59 = vld [vmem:[%s1730_s10 + $0xb8] sm:$0xff]  ;;  %v423_v60 = vld [vmem:[%s1730_s10 + $0x4a8] sm:$0xff]  ;;  %v1137_v63 = vpack.c.bf16 %v420_v57, %v418_v55  ;;  %v294_v1 = vld [vmem:[%s1730_s10 + $0xa0] sm:$0xff] }
  0x88   : > { %1132 = vmatprep.subr.bf16.mxu0 %v1131_v43  ;;  %v425_v61 = vld [vmem:[%s1730_s10 + $0x4b8] sm:$0xff]  ;;  %v1011_v0 = vpack.c.bf16 %v297_v59, %v295_v58  ;;  %v296_v2 = vld [vmem:[%s1730_s10 + $0xb0] sm:$0xff]  ;;  %v422_v3 = vld [vmem:[%s1730_s10 + $0x4a0] sm:$0xff] }
  0x89   : > { %v1139_v4 = vpack.c.bf16 %v425_v61, %v423_v60  ;;  %v424_v5 = vld [vmem:[%s1730_s10 + $0x4b0] sm:$0xff]  ;;  %v299_v6 = vld [vmem:[%s1730_s10 + $0xc8] sm:$0xff]  ;;  %v301_v7 = vld [vmem:[%s1730_s10 + $0xd8] sm:$0xff]  ;;  %v1013_v10 = vpack.c.bf16 %v296_v2, %v294_v1 }
  0x8a   : > { %1006 = vmatpush1.bf16.msra.mxu1 %v1005_v50  ;;  %v427_v8 = vld [vmem:[%s1730_s10 + $0x4c8] sm:$0xff]  ;;  %v429_v9 = vld [vmem:[%s1730_s10 + $0x4d8] sm:$0xff]  ;;  %v1141_v11 = vpack.c.bf16 %v424_v5, %v422_v3  ;;  %v1015_v12 = vpack.c.bf16 %v301_v7, %v299_v6  ;;  %v298_v13 = vld [vmem:[%s1730_s10 + $0xc0] sm:$0xff] }
  0x8b   : > { %1134 = vmatpush1.bf16.msra.mxu0 %v1133_v51  ;;  %1008 = vmatprep.subr.bf16.mxu1 %v1007_v52  ;;  %v300_v14 = vld [vmem:[%s1730_s10 + $0xd0] sm:$0xff]  ;;  %v426_v15 = vld [vmem:[%s1730_s10 + $0x4c0] sm:$0xff]  ;;  %v1143_v16 = vpack.c.bf16 %v429_v9, %v427_v8  ;;  %v303_v18 = vld [vmem:[%s1730_s10 + $0xe8] sm:$0xff] }
  0x8c   : > { %1136 = vmatprep.subr.bf16.mxu0 %v1135_v56  ;;  %v428_v17 = vld [vmem:[%s1730_s10 + $0x4d0] sm:$0xff]  ;;  %v305_v19 = vld [vmem:[%s1730_s10 + $0xf8] sm:$0xff]  ;;  %v431_v20 = vld [vmem:[%s1730_s10 + $0x4e8] sm:$0xff]  ;;  %v1017_v22 = vpack.c.bf16 %v300_v14, %v298_v13 }
  0x8d   : > { %v433_v21 = vld [vmem:[%s1730_s10 + $0x4f8] sm:$0xff]  ;;  %v1145_v23 = vpack.c.bf16 %v428_v17, %v426_v15  ;;  %v1019_v24 = vpack.c.bf16 %v305_v19, %v303_v18  ;;  %v302_v25 = vld [vmem:[%s1730_s10 + $0xe0] sm:$0xff]  ;;  %v304_v26 = vld [vmem:[%s1730_s10 + $0xf0] sm:$0xff] }
  0x8e   : > { %1010 = vmatpush1.bf16.msra.mxu1 %v1009_v62  ;;  %v430_v27 = vld [vmem:[%s1730_s10 + $0x4e0] sm:$0xff]  ;;  %v1147_v28 = vpack.c.bf16 %v433_v21, %v431_v20  ;;  %v432_v29 = vld [vmem:[%s1730_s10 + $0x4f0] sm:$0xff]  ;;  %v307_v30 = vld [vmem:[%s1730_s10 + $0x108] sm:$0xff]  ;;  %v1021_v34 = vpack.c.bf16 %v304_v26, %v302_v25 }
  0x8f   : > { %1138 = vmatpush1.bf16.msra.mxu0 %v1137_v63  ;;  %1012 = vmatprep.subr.bf16.mxu1 %v1011_v0  ;;  %v309_v31 = vld [vmem:[%s1730_s10 + $0x118] sm:$0xff]  ;;  %v435_v32 = vld [vmem:[%s1730_s10 + $0x508] sm:$0xff]  ;;  %v1149_v35 = vpack.c.bf16 %v432_v29, %v430_v27  ;;  %v306_v37 = vld [vmem:[%s1730_s10 + $0x100] sm:$0xff] }
  0x90   : > { %1140 = vmatprep.subr.bf16.mxu0 %v1139_v4  ;;  %v437_v33 = vld [vmem:[%s1730_s10 + $0x518] sm:$0xff]  ;;  %v1023_v36 = vpack.c.bf16 %v309_v31, %v307_v30  ;;  %v308_v38 = vld [vmem:[%s1730_s10 + $0x110] sm:$0xff]  ;;  %v434_v39 = vld [vmem:[%s1730_s10 + $0x500] sm:$0xff] }
  0x91   : > { %v1151_v40 = vpack.c.bf16 %v437_v33, %v435_v32  ;;  %v436_v41 = vld [vmem:[%s1730_s10 + $0x510] sm:$0xff]  ;;  %v311_v42 = vld [vmem:[%s1730_s10 + $0x128] sm:$0xff]  ;;  %v313_v43 = vld [vmem:[%s1730_s10 + $0x138] sm:$0xff]  ;;  %v1025_v46 = vpack.c.bf16 %v308_v38, %v306_v37 }
  0x92   : > { %1014 = vmatpush1.bf16.msra.mxu1 %v1013_v10  ;;  %v439_v44 = vld [vmem:[%s1730_s10 + $0x528] sm:$0xff]  ;;  %v441_v45 = vld [vmem:[%s1730_s10 + $0x538] sm:$0xff]  ;;  %v1153_v47 = vpack.c.bf16 %v436_v41, %v434_v39  ;;  %v1027_v48 = vpack.c.bf16 %v313_v43, %v311_v42  ;;  %v310_v49 = vld [vmem:[%s1730_s10 + $0x120] sm:$0xff] }
  0x93   : > { %1142 = vmatpush1.bf16.msra.mxu0 %v1141_v11  ;;  %1016 = vmatprep.subr.bf16.mxu1 %v1015_v12  ;;  %v312_v50 = vld [vmem:[%s1730_s10 + $0x130] sm:$0xff]  ;;  %v438_v51 = vld [vmem:[%s1730_s10 + $0x520] sm:$0xff]  ;;  %v1155_v52 = vpack.c.bf16 %v441_v45, %v439_v44  ;;  %v315_v54 = vld [vmem:[%s1730_s10 + $0x148] sm:$0xff] }
  0x94   : > { %1144 = vmatprep.subr.bf16.mxu0 %v1143_v16  ;;  %v440_v53 = vld [vmem:[%s1730_s10 + $0x530] sm:$0xff]  ;;  %v317_v55 = vld [vmem:[%s1730_s10 + $0x158] sm:$0xff]  ;;  %v443_v56 = vld [vmem:[%s1730_s10 + $0x548] sm:$0xff]  ;;  %v1029_v58 = vpack.c.bf16 %v312_v50, %v310_v49 }
  0x95   : > { %v445_v57 = vld [vmem:[%s1730_s10 + $0x558] sm:$0xff]  ;;  %v1157_v59 = vpack.c.bf16 %v440_v53, %v438_v51  ;;  %v1031_v60 = vpack.c.bf16 %v317_v55, %v315_v54  ;;  %v314_v61 = vld [vmem:[%s1730_s10 + $0x140] sm:$0xff]  ;;  %v316_v62 = vld [vmem:[%s1730_s10 + $0x150] sm:$0xff] }
  0x96   : > { %1018 = vmatpush1.bf16.msra.mxu1 %v1017_v22  ;;  %v442_v63 = vld [vmem:[%s1730_s10 + $0x540] sm:$0xff]  ;;  %v1159_v0 = vpack.c.bf16 %v445_v57, %v443_v56  ;;  %v444_v1 = vld [vmem:[%s1730_s10 + $0x550] sm:$0xff]  ;;  %v319_v2 = vld [vmem:[%s1730_s10 + $0x168] sm:$0xff]  ;;  %v1033_v6 = vpack.c.bf16 %v316_v62, %v314_v61 }
  0x97   : > { %1146 = vmatpush1.bf16.msra.mxu0 %v1145_v23  ;;  %1020 = vmatprep.subr.bf16.mxu1 %v1019_v24  ;;  %v321_v3 = vld [vmem:[%s1730_s10 + $0x178] sm:$0xff]  ;;  %v447_v4 = vld [vmem:[%s1730_s10 + $0x568] sm:$0xff]  ;;  %v318_v7 = vld [vmem:[%s1730_s10 + $0x160] sm:$0xff]  ;;  %v1161_v8 = vpack.c.bf16 %v444_v1, %v442_v63 }
  0x98   : > { %1148 = vmatprep.subr.bf16.mxu0 %v1147_v28  ;;  %v449_v5 = vld [vmem:[%s1730_s10 + $0x578] sm:$0xff]  ;;  %v1035_v9 = vpack.c.bf16 %v321_v3, %v319_v2  ;;  %v320_v10 = vld [vmem:[%s1730_s10 + $0x170] sm:$0xff]  ;;  %v446_v11 = vld [vmem:[%s1730_s10 + $0x560] sm:$0xff] }
  0x99   : > { %v448_v12 = vld [vmem:[%s1730_s10 + $0x570] sm:$0xff]  ;;  %v1163_v13 = vpack.c.bf16 %v449_v5, %v447_v4  ;;  %v323_v14 = vld [vmem:[%s1730_s10 + $0x188] sm:$0xff]  ;;  %v325_v15 = vld [vmem:[%s1730_s10 + $0x198] sm:$0xff]  ;;  %v1037_v20 = vpack.c.bf16 %v320_v10, %v318_v7 }
  0x9a   : > { %1022 = vmatpush1.bf16.msra.mxu1 %v1021_v34  ;;  %v265_v16 = vld [vmem:[#allocation2 + $0x8] sm:$0xff]  ;;  %v453_v18 = vld [vmem:[%s1730_s10 + $0x598] sm:$0xff]  ;;  %v1165_v21 = vpack.c.bf16 %v448_v12, %v446_v11  ;;  %v1039_v22 = vpack.c.bf16 %v325_v15, %v323_v14  ;;  %v322_v23 = vld [vmem:[%s1730_s10 + $0x180] sm:$0xff] }
  0x9b   : > { %1150 = vmatpush1.bf16.msra.mxu0 %v1149_v35  ;;  %1024 = vmatprep.subr.bf16.mxu1 %v1023_v36  ;;  %v451_v17 = vld [vmem:[%s1730_s10 + $0x588] sm:$0xff]  ;;  %v324_v24 = vld [vmem:[%s1730_s10 + $0x190] sm:$0xff]  ;;  %v450_v25 = vld [vmem:[%s1730_s10 + $0x580] sm:$0xff] }
  0x9c   : > { %1152 = vmatprep.subr.bf16.mxu0 %v1151_v40  ;;  %594 = vmatprep.mubr.f32.mxu1 %v265_v16  ;;  %v269_v19 = vld [vmem:[#allocation2 + $0x28] sm:$0xff]  ;;  %v1167_v26 = vpack.c.bf16 %v453_v18, %v451_v17  ;;  %v452_v27 = vld [vmem:[%s1730_s10 + $0x590] sm:$0xff]  ;;  %v329_v29 = vld [vmem:[%s1730_s10 + $0x1b8] sm:$0xff]  ;;  %v1041_v32 = vpack.c.bf16 %v324_v24, %v322_v23 }
  0x9d   : > { %736 = vmatprep.mubr.f32.mxu0 %v269_v19  ;;  %v327_v28 = vld [vmem:[%s1730_s10 + $0x1a8] sm:$0xff]  ;;  %v457_v31 = vld [vmem:[%s1730_s10 + $0x5b8] sm:$0xff]  ;;  %v1169_v33 = vpack.c.bf16 %v452_v27, %v450_v25  ;;  %v326_v35 = vld [vmem:[%s1730_s10 + $0x1a0] sm:$0xff] }
  0x9e   : > { %1026 = vmatpush1.bf16.msra.mxu1 %v1025_v46  ;;  %v455_v30 = vld [vmem:[%s1730_s10 + $0x5a8] sm:$0xff]  ;;  %v1043_v34 = vpack.c.bf16 %v329_v29, %v327_v28  ;;  %v328_v36 = vld [vmem:[%s1730_s10 + $0x1b0] sm:$0xff]  ;;  %v454_v37 = vld [vmem:[%s1730_s10 + $0x5a0] sm:$0xff] }
  0x9f   : > { %1154 = vmatpush1.bf16.msra.mxu0 %v1153_v47  ;;  %1028 = vmatprep.subr.bf16.mxu1 %v1027_v48  ;;  %v1171_v38 = vpack.c.bf16 %v457_v31, %v455_v30  ;;  %v456_v39 = vld [vmem:[%s1730_s10 + $0x5b0] sm:$0xff]  ;;  %v331_v40 = vld [vmem:[%s1730_s10 + $0x1c8] sm:$0xff]  ;;  %v333_v41 = vld [vmem:[%s1730_s10 + $0x1d8] sm:$0xff]  ;;  %v1045_v44 = vpack.c.bf16 %v328_v36, %v326_v35 }
  0xa0   : > { %1156 = vmatprep.subr.bf16.mxu0 %v1155_v52  ;;  %v459_v42 = vld [vmem:[%s1730_s10 + $0x5c8] sm:$0xff]  ;;  %v461_v43 = vld [vmem:[%s1730_s10 + $0x5d8] sm:$0xff]  ;;  %v1173_v45 = vpack.c.bf16 %v456_v39, %v454_v37  ;;  %v1047_v46 = vpack.c.bf16 %v333_v41, %v331_v40  ;;  %v330_v47 = vld [vmem:[%s1730_s10 + $0x1c0] sm:$0xff] }
  0xa1   : > { %v332_v48 = vld [vmem:[%s1730_s10 + $0x1d0] sm:$0xff]  ;;  %v458_v49 = vld [vmem:[%s1730_s10 + $0x5c0] sm:$0xff]  ;;  %v1175_v50 = vpack.c.bf16 %v461_v43, %v459_v42  ;;  %v335_v52 = vld [vmem:[%s1730_s10 + $0x1e8] sm:$0xff] }
  0xa2   : > { %1030 = vmatpush1.bf16.msra.mxu1 %v1029_v58  ;;  %v460_v51 = vld [vmem:[%s1730_s10 + $0x5d0] sm:$0xff]  ;;  %v337_v53 = vld [vmem:[%s1730_s10 + $0x1f8] sm:$0xff]  ;;  %v463_v54 = vld [vmem:[%s1730_s10 + $0x5e8] sm:$0xff]  ;;  %v1049_v56 = vpack.c.bf16 %v332_v48, %v330_v47 }
  0xa3   : > { %1158 = vmatpush1.bf16.msra.mxu0 %v1157_v59  ;;  %1032 = vmatprep.subr.bf16.mxu1 %v1031_v60  ;;  %v465_v55 = vld [vmem:[%s1730_s10 + $0x5f8] sm:$0xff]  ;;  %v1177_v57 = vpack.c.bf16 %v460_v51, %v458_v49  ;;  %v1051_v58 = vpack.c.bf16 %v337_v53, %v335_v52  ;;  %v334_v59 = vld [vmem:[%s1730_s10 + $0x1e0] sm:$0xff]  ;;  %v336_v60 = vld [vmem:[%s1730_s10 + $0x1f0] sm:$0xff] }
  0xa4   : > { %1160 = vmatprep.subr.bf16.mxu0 %v1159_v0  ;;  %v462_v61 = vld [vmem:[%s1730_s10 + $0x5e0] sm:$0xff]  ;;  %v1179_v62 = vpack.c.bf16 %v465_v55, %v463_v54  ;;  %v464_v63 = vld [vmem:[%s1730_s10 + $0x5f0] sm:$0xff]  ;;  %v339_v0 = vld [vmem:[%s1730_s10 + $0x208] sm:$0xff]  ;;  %v1053_v4 = vpack.c.bf16 %v336_v60, %v334_v59 }
  0xa5   : > { %v341_v1 = vld [vmem:[%s1730_s10 + $0x218] sm:$0xff]  ;;  %v467_v2 = vld [vmem:[%s1730_s10 + $0x608] sm:$0xff]  ;;  %v1181_v5 = vpack.c.bf16 %v464_v63, %v462_v61  ;;  %v338_v7 = vld [vmem:[%s1730_s10 + $0x200] sm:$0xff] }
  0xa6   : > { %1034 = vmatpush1.bf16.msra.mxu1 %v1033_v6  ;;  %v469_v3 = vld [vmem:[%s1730_s10 + $0x618] sm:$0xff]  ;;  %v1055_v6 = vpack.c.bf16 %v341_v1, %v339_v0  ;;  %v468_v11 = vld [vmem:[%s1730_s10 + $0x610] sm:$0xff]  ;;  %v343_v12 = vld [vmem:[%s1730_s10 + $0x228] sm:$0xff] }
  0xa7   : > { %1162 = vmatpush1.bf16.msra.mxu0 %v1161_v8  ;;  %1036 = vmatprep.subr.bf16.mxu1 %v1035_v9  ;;  %v340_v8 = vld [vmem:[%s1730_s10 + $0x210] sm:$0xff]  ;;  %v466_v9 = vld [vmem:[%s1730_s10 + $0x600] sm:$0xff]  ;;  %v1183_v10 = vpack.c.bf16 %v469_v3, %v467_v2  ;;  %v471_v14 = vld [vmem:[%s1730_s10 + $0x628] sm:$0xff] }
  0xa8   : > { %1164 = vmatprep.subr.bf16.mxu0 %v1163_v13  ;;  %v345_v13 = vld [vmem:[%s1730_s10 + $0x238] sm:$0xff]  ;;  %v264_v16 = vld [vmem:[#allocation2] sm:$0xff]  ;;  %v1057_v17 = vpack.c.bf16 %v340_v8, %v338_v7  ;;  %v1185_v19 = vpack.c.bf16 %v468_v11, %v466_v9  ;;  %v472_v25 = vld [vmem:[%s1730_s10 + $0x630] sm:$0xff] }
  0xa9   : > { %v473_v15 = vld [vmem:[%s1730_s10 + $0x638] sm:$0xff]  ;;  %v268_v18 = vld [vmem:[#allocation2 + $0x20] sm:$0xff]  ;;  %v475_v28 = vld [vmem:[%s1730_s10 + $0x648] sm:$0xff] }
  0xaa   : > { %1038 = vmatpush1.bf16.msra.mxu1 %v1037_v20  ;;  %v1059_v20 = vpack.c.bf16 %v345_v13, %v343_v12  ;;  %v470_v23 = vld [vmem:[%s1730_s10 + $0x620] sm:$0xff]  ;;  %v1187_v24 = vpack.c.bf16 %v473_v15, %v471_v14  ;;  %v349_v27 = vld [vmem:[%s1730_s10 + $0x258] sm:$0xff]  ;;  %v476_v37 = vld [vmem:[%s1730_s10 + $0x650] sm:$0xff] }
  0xab   : > { %1166 = vmatpush1.bf16.msra.mxu0 %v1165_v21  ;;  %1040 = vmatprep.subr.bf16.mxu1 %v1039_v22  ;;  %v342_v21 = vld [vmem:[%s1730_s10 + $0x220] sm:$0xff]  ;;  %v344_v22 = vld [vmem:[%s1730_s10 + $0x230] sm:$0xff]  ;;  %v477_v29 = vld [vmem:[%s1730_s10 + $0x658] sm:$0xff]  ;;  %v1189_v31 = vpack.c.bf16 %v472_v25, %v470_v23 }
  0xac   : > { %1168 = vmatprep.subr.bf16.mxu0 %v1167_v26  ;;  %v347_v26 = vld [vmem:[%s1730_s10 + $0x248] sm:$0xff]  ;;  %v1061_v30 = vpack.c.bf16 %v344_v22, %v342_v21  ;;  %v474_v35 = vld [vmem:[%s1730_s10 + $0x640] sm:$0xff]  ;;  %v1191_v36 = vpack.c.bf16 %v477_v29, %v475_v28  ;;  %v353_v39 = vld [vmem:[%s1730_s10 + $0x278] sm:$0xff] }
  0xad   : > { %v479_v40 = vld [vmem:[%s1730_s10 + $0x668] sm:$0xff]  ;;  %v481_v41 = vld [vmem:[%s1730_s10 + $0x678] sm:$0xff]  ;;  %v1193_v43 = vpack.c.bf16 %v476_v37, %v474_v35  ;;  %v478_v47 = vld [vmem:[%s1730_s10 + $0x660] sm:$0xff] }
  0xae   : > { %1042 = vmatpush1.bf16.msra.mxu1 %v1041_v32  ;;  %v1063_v32 = vpack.c.bf16 %v349_v27, %v347_v26  ;;  %v1195_v48 = vpack.c.bf16 %v481_v41, %v479_v40  ;;  %v480_v49 = vld [vmem:[%s1730_s10 + $0x670] sm:$0xff]  ;;  %v357_v51 = vld [vmem:[%s1730_s10 + $0x298] sm:$0xff]  ;;  %v483_v52 = vld [vmem:[%s1730_s10 + $0x688] sm:$0xff] }
  0xaf   : > { %1170 = vmatpush1.bf16.msra.mxu0 %v1169_v33  ;;  %1044 = vmatprep.subr.bf16.mxu1 %v1043_v34  ;;  %v346_v33 = vld [vmem:[%s1730_s10 + $0x240] sm:$0xff]  ;;  %v348_v34 = vld [vmem:[%s1730_s10 + $0x250] sm:$0xff]  ;;  %v485_v53 = vld [vmem:[%s1730_s10 + $0x698] sm:$0xff]  ;;  %v1197_v55 = vpack.c.bf16 %v480_v49, %v478_v47 }
  0xb0   : > { %1172 = vmatprep.subr.bf16.mxu0 %v1171_v38  ;;  %v351_v38 = vld [vmem:[%s1730_s10 + $0x268] sm:$0xff]  ;;  %v1065_v42 = vpack.c.bf16 %v348_v34, %v346_v33  ;;  %v482_v59 = vld [vmem:[%s1730_s10 + $0x680] sm:$0xff]  ;;  %v1199_v60 = vpack.c.bf16 %v485_v53, %v483_v52  ;;  %v484_v61 = vld [vmem:[%s1730_s10 + $0x690] sm:$0xff] }
  0xb1   : > { %v361_v63 = vld [vmem:[%s1730_s10 + $0x2b8] sm:$0xff]  ;;  %v487_v0 = vld [vmem:[%s1730_s10 + $0x6a8] sm:$0xff]  ;;  %v1201_v3 = vpack.c.bf16 %v484_v61, %v482_v59  ;;  %v486_v7 = vld [vmem:[%s1730_s10 + $0x6a0] sm:$0xff] }
  0xb2   : > { %1046 = vmatpush1.bf16.msra.mxu1 %v1045_v44  ;;  %v1067_v44 = vpack.c.bf16 %v353_v39, %v351_v38  ;;  %v489_v1 = vld [vmem:[%s1730_s10 + $0x6b8] sm:$0xff]  ;;  %v488_v9 = vld [vmem:[%s1730_s10 + $0x6b0] sm:$0xff]  ;;  %v491_v12 = vld [vmem:[%s1730_s10 + $0x6c8] sm:$0xff] }
  0xb3   : > { %1174 = vmatpush1.bf16.msra.mxu0 %v1173_v45  ;;  %1048 = vmatprep.subr.bf16.mxu1 %v1047_v46  ;;  %v350_v45 = vld [vmem:[%s1730_s10 + $0x260] sm:$0xff]  ;;  %v352_v46 = vld [vmem:[%s1730_s10 + $0x270] sm:$0xff]  ;;  %v1203_v8 = vpack.c.bf16 %v489_v1, %v487_v0  ;;  %v365_v11 = vld [vmem:[%s1730_s10 + $0x2d8] sm:$0xff] }
  0xb4   : > { %1176 = vmatprep.subr.bf16.mxu0 %v1175_v50  ;;  %v355_v50 = vld [vmem:[%s1730_s10 + $0x288] sm:$0xff]  ;;  %v1069_v54 = vpack.c.bf16 %v352_v46, %v350_v45  ;;  %v493_v13 = vld [vmem:[%s1730_s10 + $0x6d8] sm:$0xff]  ;;  %v362_v15 = vld [vmem:[%s1730_s10 + $0x2c0] sm:$0xff] }
  0xb5   : > { %v1207_v21 = vpack.c.bf16 %v493_v13, %v491_v12  ;;  %v367_v22 = vld [vmem:[%s1730_s10 + $0x2e8] sm:$0xff]  ;;  %v369_v23 = vld [vmem:[%s1730_s10 + $0x2f8] sm:$0xff]  ;;  %v494_v33 = vld [vmem:[%s1730_s10 + $0x6e0] sm:$0xff] }
  0xb6   : > { %1050 = vmatpush1.bf16.msra.mxu1 %v1049_v56  ;;  %v1071_v56 = vpack.c.bf16 %v357_v51, %v355_v50  ;;  %v495_v25 = vld [vmem:[%s1730_s10 + $0x6e8] sm:$0xff]  ;;  %v497_v26 = vld [vmem:[%s1730_s10 + $0x6f8] sm:$0xff]  ;;  %v496_v35 = vld [vmem:[%s1730_s10 + $0x6f0] sm:$0xff] }
  0xb7   : > { %1178 = vmatpush1.bf16.msra.mxu0 %v1177_v57  ;;  %1052 = vmatprep.subr.bf16.mxu1 %v1051_v58  ;;  %v354_v57 = vld [vmem:[%s1730_s10 + $0x280] sm:$0xff]  ;;  %v356_v58 = vld [vmem:[%s1730_s10 + $0x290] sm:$0xff]  ;;  %v271_v27 = vld [vmem:[#allocation2 + $0x38] sm:$0xff]  ;;  %v1211_v34 = vpack.c.bf16 %v497_v26, %v495_v25  ;;  %v1213_v41 = vpack.c.bf16 %v496_v35, %v494_v33 }
  0xb8   : > { %1180 = vmatprep.subr.bf16.mxu0 %v1179_v62  ;;  %v359_v62 = vld [vmem:[%s1730_s10 + $0x2a8] sm:$0xff]  ;;  %v1073_v2 = vpack.c.bf16 %v356_v58, %v354_v57  ;;  %v373_v37 = vld [vmem:[%s1730_s10 + $0x318] sm:$0xff]  ;;  %v498_v45 = vld [vmem:[%s1730_s10 + $0x700] sm:$0xff] }
  0xb9   : > { %v499_v38 = vld [vmem:[%s1730_s10 + $0x708] sm:$0xff]  ;;  %v501_v39 = vld [vmem:[%s1730_s10 + $0x718] sm:$0xff]  ;;  %v500_v47 = vld [vmem:[%s1730_s10 + $0x710] sm:$0xff] }
  0xba   : > { %1054 = vmatpush1.bf16.msra.mxu1 %v1053_v4  ;;  %v1075_v4 = vpack.c.bf16 %v361_v63, %v359_v62  ;;  %v1215_v46 = vpack.c.bf16 %v501_v39, %v499_v38  ;;  %v377_v49 = vld [vmem:[%s1730_s10 + $0x338] sm:$0xff]  ;;  %v503_v50 = vld [vmem:[%s1730_s10 + $0x728] sm:$0xff]  ;;  %v1217_v53 = vpack.c.bf16 %v500_v47, %v498_v45  ;;  %v502_v57 = vld [vmem:[%s1730_s10 + $0x720] sm:$0xff] }
  0xbb   : > { %1182 = vmatpush1.bf16.msra.mxu0 %v1181_v5  ;;  %1056 = vmatprep.subr.bf16.mxu1 %v1055_v6  ;;  %v358_v5 = vld [vmem:[%s1730_s10 + $0x2a0] sm:$0xff]  ;;  %v360_v6 = vld [vmem:[%s1730_s10 + $0x2b0] sm:$0xff]  ;;  %v505_v51 = vld [vmem:[%s1730_s10 + $0x738] sm:$0xff] }
  0xbc   : > { %1184 = vmatprep.subr.bf16.mxu0 %v1183_v10  ;;  %v363_v10 = vld [vmem:[%s1730_s10 + $0x2c8] sm:$0xff]  ;;  %v1077_v14 = vpack.c.bf16 %v360_v6, %v358_v5  ;;  %v1219_v58 = vpack.c.bf16 %v505_v51, %v503_v50  ;;  %v504_v59 = vld [vmem:[%s1730_s10 + $0x730] sm:$0xff]  ;;  %v381_v61 = vld [vmem:[%s1730_s10 + $0x358] sm:$0xff] }
  0xbd   : > { %595 = vmatmul.mubr.f32.vlgmr.msra.gmra.mrb[0].mxu1 %v264_v16  ;;  %v1205_v16 = vpack.c.bf16 %v488_v9, %v486_v7  ;;  %v507_v62 = vld [vmem:[%s1730_s10 + $0x748] sm:$0xff]  ;;  %v509_v63 = vld [vmem:[%s1730_s10 + $0x758] sm:$0xff]  ;;  %v1221_v1 = vpack.c.bf16 %v504_v59, %v502_v57  ;;  %v506_v5 = vld [vmem:[%s1730_s10 + $0x740] sm:$0xff] }
  0xbe   : > { %1058 = vmatpush1.bf16.msra.mxu1 %v1057_v17  ;;  %737 = vmatmul.mubr.f32.vlgmr.msra.gmra.mrb[0].mxu0 %v268_v18  ;;  %v1079_v17 = vpack.c.bf16 %v365_v11, %v363_v10  ;;  %v364_v18 = vld [vmem:[%s1730_s10 + $0x2d0] sm:$0xff]  ;;  %v1223_v6 = vpack.c.bf16 %v509_v63, %v507_v62  ;;  %v385_v9 = vld [vmem:[%s1730_s10 + $0x378] sm:$0xff]  ;;  %v511_v10 = vld [vmem:[%s1730_s10 + $0x768] sm:$0xff] }
  0xbf   : > { %1186 = vmatpush1.bf16.msra.mxu0 %v1185_v19  ;;  %1060 = vmatprep.subr.bf16.mxu1 %v1059_v20  ;;  %v490_v19 = vld [vmem:[%s1730_s10 + $0x6c0] sm:$0xff]  ;;  %v492_v20 = vld [vmem:[%s1730_s10 + $0x6d0] sm:$0xff]  ;;  %v1081_v28 = vpack.c.bf16 %v364_v18, %v362_v15  ;;  %v513_v11 = vld [vmem:[%s1730_s10 + $0x778] sm:$0xff] }
  0xc0   : > { %1188 = vmatprep.subr.bf16.mxu0 %v1187_v24  ;;  %v267_v24 = vld [vmem:[#allocation2 + $0x18] sm:$0xff]  ;;  %807 = vmatprep.mubr.f32.mxu0 %v271_v27  ;;  %v1209_v29 = vpack.c.bf16 %v492_v20, %v490_v19  ;;  %v508_v7 = vld [vmem:[%s1730_s10 + $0x750] sm:$0xff]  ;;  %v382_v15 = vld [vmem:[%s1730_s10 + $0x360] sm:$0xff]  ;;  %v1227_v18 = vpack.c.bf16 %v513_v11, %v511_v10 }
  0xc1   : > { %665 = vmatprep.mubr.f32.mxu1 %v267_v24  ;;  %v1225_v13 = vpack.c.bf16 %v508_v7, %v506_v5  ;;  %v512_v19 = vld [vmem:[%s1730_s10 + $0x770] sm:$0xff]  ;;  %v387_v20 = vld [vmem:[%s1730_s10 + $0x388] sm:$0xff]  ;;  %v386_v27 = vld [vmem:[%s1730_s10 + $0x380] sm:$0xff] }
  0xc2   : > { %1062 = vmatpush1.bf16.msra.mxu1 %v1061_v30  ;;  %v1083_v30 = vpack.c.bf16 %v369_v23, %v367_v22  ;;  %v515_v22 = vld [vmem:[%s1730_s10 + $0x788] sm:$0xff]  ;;  %v517_v23 = vld [vmem:[%s1730_s10 + $0x798] sm:$0xff]  ;;  %v390_v39 = vld [vmem:[%s1730_s10 + $0x3a0] sm:$0xff] }
  0xc3   : > { %1190 = vmatpush1.bf16.msra.mxu0 %v1189_v31  ;;  %1064 = vmatprep.subr.bf16.mxu1 %v1063_v32  ;;  %v366_v31 = vld [vmem:[%s1730_s10 + $0x2e0] sm:$0xff]  ;;  %v368_v32 = vld [vmem:[%s1730_s10 + $0x2f0] sm:$0xff]  ;;  %v393_v33 = vld [vmem:[%s1730_s10 + $0x3b8] sm:$0xff] }
  0xc4   : > { %1192 = vmatprep.subr.bf16.mxu0 %v1191_v36  ;;  %v371_v36 = vld [vmem:[%s1730_s10 + $0x308] sm:$0xff]  ;;  %v1085_v40 = vpack.c.bf16 %v368_v32, %v366_v31  ;;  %v516_v31 = vld [vmem:[%s1730_s10 + $0x790] sm:$0xff]  ;;  %v521_v35 = vld [vmem:[%s1730_s10 + $0x7b8] sm:$0xff] }
  0xc5   : > { %v391_v32 = vld [vmem:[%s1730_s10 + $0x3a8] sm:$0xff]  ;;  %v397_v45 = vld [vmem:[%s1730_s10 + $0x3d8] sm:$0xff]  ;;  %v394_v51 = vld [vmem:[%s1730_s10 + $0x3c0] sm:$0xff] }
  0xc6   : > { %1066 = vmatpush1.bf16.msra.mxu1 %v1065_v42  ;;  %v1087_v42 = vpack.c.bf16 %v373_v37, %v371_v36  ;;  %v1107_v38 = vpack.c.bf16 %v393_v33, %v391_v32  ;;  %v525_v47 = vld [vmem:[%s1730_s10 + $0x7d8] sm:$0xff]  ;;  %v398_v63 = vld [vmem:[%s1730_s10 + $0x3e0] sm:$0xff]  ;;  %v270_v7 = vld [vmem:[#allocation2 + $0x30] sm:$0xff] }
  0xc7   : > { %1194 = vmatpush1.bf16.msra.mxu0 %v1193_v43  ;;  %1068 = vmatprep.subr.bf16.mxu1 %v1067_v44  ;;  %v370_v43 = vld [vmem:[%s1730_s10 + $0x300] sm:$0xff]  ;;  %v372_v44 = vld [vmem:[%s1730_s10 + $0x310] sm:$0xff]  ;;  %v401_v57 = vld [vmem:[%s1730_s10 + $0x3f8] sm:$0xff] }
  0xc8   : > { %1196 = vmatprep.subr.bf16.mxu0 %v1195_v48  ;;  %v375_v48 = vld [vmem:[%s1730_s10 + $0x328] sm:$0xff]  ;;  %v1089_v52 = vpack.c.bf16 %v372_v44, %v370_v43  ;;  %v520_v43 = vld [vmem:[%s1730_s10 + $0x7b0] sm:$0xff]  ;;  %v529_v59 = vld [vmem:[%s1730_s10 + $0x7f8] sm:$0xff] }
  0xc9   : > { %v395_v44 = vld [vmem:[%s1730_s10 + $0x3c8] sm:$0xff]  ;;  %v823_v11 = vld [vmem:[%s226_s9] sm:$0x3] }
  0xca   : > { %1070 = vmatpush1.bf16.msra.mxu1 %v1069_v54  ;;  %v1091_v54 = vpack.c.bf16 %v377_v49, %v375_v48  ;;  %v1111_v50 = vpack.c.bf16 %v397_v45, %v395_v44 }
  0xcb   : > { %1198 = vmatpush1.bf16.msra.mxu0 %v1197_v55  ;;  %1072 = vmatprep.subr.bf16.mxu1 %v1071_v56  ;;  %v374_v55 = vld [vmem:[%s1730_s10 + $0x320] sm:$0xff]  ;;  %v376_v56 = vld [vmem:[%s1730_s10 + $0x330] sm:$0xff] }
  0xcc   : > { %1200 = vmatprep.subr.bf16.mxu0 %v1199_v60  ;;  %v379_v60 = vld [vmem:[%s1730_s10 + $0x348] sm:$0xff]  ;;  %v1093_v0 = vpack.c.bf16 %v376_v56, %v374_v55  ;;  %v524_v55 = vld [vmem:[%s1730_s10 + $0x7d0] sm:$0xff] }
  0xcd   : > { %v399_v56 = vld [vmem:[%s1730_s10 + $0x3e8] sm:$0xff] }
  0xce   : > { %1074 = vmatpush1.bf16.msra.mxu1 %v1073_v2  ;;  %v1095_v2 = vpack.c.bf16 %v381_v61, %v379_v60  ;;  %v1115_v62 = vpack.c.bf16 %v401_v57, %v399_v56 }
  0xcf   : > { %1202 = vmatpush1.bf16.msra.mxu0 %v1201_v3  ;;  %1076 = vmatprep.subr.bf16.mxu1 %v1075_v4  ;;  %v378_v3 = vld [vmem:[%s1730_s10 + $0x340] sm:$0xff]  ;;  %v380_v4 = vld [vmem:[%s1730_s10 + $0x350] sm:$0xff] }
  0xd0   : > { %1204 = vmatprep.subr.bf16.mxu0 %v1203_v8  ;;  %v383_v8 = vld [vmem:[%s1730_s10 + $0x368] sm:$0xff]  ;;  %v1097_v12 = vpack.c.bf16 %v380_v4, %v378_v3  ;;  %v528_v3 = vld [vmem:[%s1730_s10 + $0x7f0] sm:$0xff] }
  0xd2   : > { %1078 = vmatpush1.bf16.msra.mxu1 %v1077_v14  ;;  %v1099_v14 = vpack.c.bf16 %v385_v9, %v383_v8  ;;  %v825_v8 = vlaneseq }
  0xd3   : > { %1206 = vmatpush1.bf16.msra.mxu0 %v1205_v16  ;;  %1080 = vmatprep.subr.bf16.mxu1 %v1079_v17  ;;  %v384_v16 = vld [vmem:[%s1730_s10 + $0x370] sm:$0xff]  ;;  %v510_v17 = vld [vmem:[%s1730_s10 + $0x760] sm:$0xff] }
  0xd4   : > { %1208 = vmatprep.subr.bf16.mxu0 %v1207_v21  ;;  %v389_v21 = vld [vmem:[%s1730_s10 + $0x398] sm:$0xff]  ;;  %v1101_v24 = vpack.c.bf16 %v384_v16, %v382_v15  ;;  %v1229_v25 = vpack.c.bf16 %v512_v19, %v510_v17  ;;  %v826_v9 = vshrl.u32 %v825_v8, 7 }
  0xd5   : > { %v1103_v26 = vpack.c.bf16 %v389_v21, %v387_v20 }
  0xd6   : > { %1082 = vmatpush1.bf16.msra.mxu1 %v1081_v28  ;;  %v388_v28 = vld [vmem:[%s1730_s10 + $0x390] sm:$0xff]  ;;  %v827_v10 = vsub.s32 0, %v826_v9 }
  0xd7   : > { %1210 = vmatpush1.bf16.msra.mxu0 %v1209_v29  ;;  %1084 = vmatprep.subr.bf16.mxu1 %v1083_v30  ;;  %v514_v29 = vld [vmem:[%s1730_s10 + $0x780] sm:$0xff]  ;;  %v1231_v30 = vpack.c.bf16 %v517_v23, %v515_v22  ;;  %v1105_v36 = vpack.c.bf16 %v388_v28, %v386_v27 }
  0xd8   : > { %1212 = vmatprep.subr.bf16.mxu0 %v1211_v34  ;;  %v519_v34 = vld [vmem:[%s1730_s10 + $0x7a8] sm:$0xff]  ;;  %v1233_v37 = vpack.c.bf16 %v516_v31, %v514_v29 }
  0xda   : > { %1086 = vmatpush1.bf16.msra.mxu1 %v1085_v40  ;;  %v392_v40 = vld [vmem:[%s1730_s10 + $0x3b0] sm:$0xff] }
  0xdb   : > { %1214 = vmatpush1.bf16.msra.mxu0 %v1213_v41  ;;  %1088 = vmatprep.subr.bf16.mxu1 %v1087_v42  ;;  %v518_v41 = vld [vmem:[%s1730_s10 + $0x7a0] sm:$0xff]  ;;  %v1235_v42 = vpack.c.bf16 %v521_v35, %v519_v34  ;;  %v1109_v48 = vpack.c.bf16 %v392_v40, %v390_v39 }
  0xdc   : > { %1216 = vmatprep.subr.bf16.mxu0 %v1215_v46  ;;  %v523_v46 = vld [vmem:[%s1730_s10 + $0x7c8] sm:$0xff]  ;;  %v1237_v49 = vpack.c.bf16 %v520_v43, %v518_v41 }
  0xde   : > { %1090 = vmatpush1.bf16.msra.mxu1 %v1089_v52  ;;  %v396_v52 = vld [vmem:[%s1730_s10 + $0x3d0] sm:$0xff] }
  0xdf   : > { %1218 = vmatpush1.bf16.msra.mxu0 %v1217_v53  ;;  %1092 = vmatprep.subr.bf16.mxu1 %v1091_v54  ;;  %v522_v53 = vld [vmem:[%s1730_s10 + $0x7c0] sm:$0xff]  ;;  %v1239_v54 = vpack.c.bf16 %v525_v47, %v523_v46  ;;  %v1113_v60 = vpack.c.bf16 %v396_v52, %v394_v51 }
  0xe0   : > { %1220 = vmatprep.subr.bf16.mxu0 %v1219_v58  ;;  %v527_v58 = vld [vmem:[%s1730_s10 + $0x7e8] sm:$0xff]  ;;  %v1241_v61 = vpack.c.bf16 %v524_v55, %v522_v53 }
  0xe2   : > { %1094 = vmatpush1.bf16.msra.mxu1 %v1093_v0  ;;  %v400_v0 = vld [vmem:[%s1730_s10 + $0x3f0] sm:$0xff] }
  0xe3   : > { %1222 = vmatpush1.bf16.msra.mxu0 %v1221_v1  ;;  %1096 = vmatprep.subr.bf16.mxu1 %v1095_v2  ;;  %v1243_v1 = vpack.c.bf16 %v529_v59, %v527_v58  ;;  %v526_v2 = vld [vmem:[%s1730_s10 + $0x7e0] sm:$0xff]  ;;  %v1117_v4 = vpack.c.bf16 %v400_v0, %v398_v63 }
  0xe4   : > { %1224 = vmatprep.subr.bf16.mxu0 %v1223_v6  ;;  %v1245_v5 = vpack.c.bf16 %v528_v3, %v526_v2  ;;  %v266_v6 = vld [vmem:[#allocation2 + $0x10] sm:$0xff] }
  0xe6   : > { %1098 = vmatpush1.bf16.msra.mxu1 %v1097_v12  ;;  %v831_v12 = vsub.s32 1, %v826_v9 }
  0xe7   : > { %1226 = vmatpush1.bf16.msra.mxu0 %v1225_v13  ;;  %1100 = vmatprep.subr.bf16.mxu1 %v1099_v14 }
  0xe8   : > { %1228 = vmatprep.subr.bf16.mxu0 %v1227_v18  ;;  %v828_v18 = vrot.slane %v823_v11, %v827_v10  ;;  %v832_v20 = vrot.slane %v823_v11, %v831_v12 }
  0xea   : > { %1102 = vmatpush1.bf16.msra.mxu1 %v1101_v24 }
  0xeb   : > { %1230 = vmatpush1.bf16.msra.mxu0 %v1229_v25  ;;  %1104 = vmatprep.subr.bf16.mxu1 %v1103_v26 }
  0xec   : > { %1232 = vmatprep.subr.bf16.mxu0 %v1231_v30 }
  0xee   : > { %1106 = vmatpush1.bf16.msra.mxu1 %v1105_v36 }
  0xef   : > { %1234 = vmatpush1.bf16.msra.mxu0 %v1233_v37  ;;  %1108 = vmatprep.subr.bf16.mxu1 %v1107_v38 }
  0xf0   : > { %1236 = vmatprep.subr.bf16.mxu0 %v1235_v42 }
  0xf2   : > { %1110 = vmatpush1.bf16.msra.mxu1 %v1109_v48 }
  0xf3   : > { %1238 = vmatpush1.bf16.msra.mxu0 %v1237_v49  ;;  %1112 = vmatprep.subr.bf16.mxu1 %v1111_v50 }
  0xf4   : > { %1240 = vmatprep.subr.bf16.mxu0 %v1239_v54 }
  0xf6   : > { %1114 = vmatpush1.bf16.msra.mxu1 %v1113_v60 }
  0xf7   : > { %1242 = vmatpush1.bf16.msra.mxu0 %v1241_v61  ;;  %1116 = vmatprep.subr.bf16.mxu1 %v1115_v62 }
  0xf8   : > { %1244 = vmatprep.subr.bf16.mxu0 %v1243_v1 }
  0xfa   : > { %1118 = vmatpush1.bf16.msra.mxu1 %v1117_v4 }
  0xfb   : > { %1246 = vmatpush1.bf16.msra.mxu0 %v1245_v5 }
  0xfd   : > { %666 = vmatmul.mubr.f32.vlgmr.msra.gmra.mrb[0].mxu1 %v266_v6 }
  0xfe   : > { %808 = vmatmul.mubr.f32.vlgmr.msra.gmra.mrb[0].mxu0 %v270_v7 }
 0x1d0   : > { %v667_v13 = vpop.f32.mrb[0].mxu1 }
 0x1d1   : > { %v809_v14 = vpop.f32.mrb[0].mxu0  ;;  %v669_v15 = vpop.f32.mrb[1].mxu1 }
 0x1d2   : > { %v1247_v16 = vadd.f32 %v809_v14, %v667_v13  ;;  %v811_v17 = vpop.f32.mrb[1].mxu0 }
 0x1d3   : > { %v1248_v19 = vadd.f32 %v811_v17, %v669_v15 }
 0x1d4   : > { %v835_v21 = vadd.f32 %v1247_v16, %v828_v18 }
 0x1d5   : > { %v836_v22 = vadd.f32 %v1248_v19, %v832_v20 }
 0x1d6   : > { %837 = vst [vmem:[%s253_s27] sm:$0xff] %v835_v21 }
 0x1d7   : > { %838 = vst [vmem:[%s253_s27 + $0x8] sm:$0xff] %v836_v22 }
 0x1d8   : > { %1436 = shalt.err (!%p1433_p2)
}
 0x1d9   : > { %s1437_s23 = scalar_lea.hbm %s1998_s8, 256  ;;  %s1441_s6 = scalar_lea.hbm %s2050_s3, 512 }
 0x1da   : > { %p1438_p6 = scmp.ne.s32.totalorder %s1998_s8, %s1437_s23  ;;  %p1442_p8 = scmp.lt.u32.totalorder %s1998_s8, %s2050_s3 }
 0x1db   : > { %p1443_p5 = scmp.lt.u32.totalorder %s1441_s6, %s1437_s23  ;;  %p1445_p10 = scmp.lt.u32.totalorder %s1437_s23, %s1998_s8 }
 0x1dc   : > { %p1439_p12 = pnand %p1438_p6, %p2069_p13 }
 0x1dd   : > { %p1444_p11 = por %p1443_p5, %p1442_p8 }
 0x1de   : > { %p1440_p9 = pneg %p1439_p12 }
 0x1df   : > { %p1446_p0 = por %p1445_p10, %p1444_p11 }
 0x1e1   : > { %p1447_p7 = pnand %p1446_p0, %p1440_p9 }
 0x1e3   : > { %1450 = shalt.err (!%p1447_p7)
}
 0x1e4   : > { %1261 = dma.vmem_to_hbm [thread:$0]  (%p2069_p13), %s2000_s19, 256, %s1998_s8, %s840_s22  }
 0x1e5 PF: > { %s866_s7 = sand.u32 1, %s1489_s12   ;;  %p2070_p4 = scmp.ne.s32.totalorder %s2061_s4, 0 }
 0x1e6   : > { %p2071_p1 = scmp.ge.s32.totalorder %s1509_s17, 2  ;;  %s867_s9 = scalar_lea.sflag [#allocation4], %s866_s7 }
 0x1e8   : > { %p1275_p3 = pnand %p2071_p1, %p2070_p4 }
 0x1ea   : > { %1484 = dma.done.wait (!%p1275_p3), %s867_s9, 256  }
 0x1eb   : > { %1486 = vsyncadd (!%p1275_p3), %s867_s9, 4294967040  ;;  %s20_s17 = sadd.s32 1, %s1509_s17   ;;  %s2072_s12 = smov %s1493_s13 }
 0x1ec   : > { %p17_p2 = scmp.ge.s32.totalorder %s20_s17, 4   ;;  %s2073_s13 = smov %s1497_s14 }
 0x1ed   : > { %s2074_s14 = smov %s1586_s24  ;;  %s2075_s15 = smov %s1505_s16 }
 0x1ee   : > { %s2076_s16 = smov %s2078_s18  ;;  %19 = sbr.rel (!%p17_p2) target bundleno = 9 (0x9), region = 101 }
 0x1f5   :  { %872 = vsyncpa [#allocation3], 1 }
 0x1f6   :  { %874 = vsyncpa [#allocation3 + $0x1], 1 }
 0x1f7   :  { %875 = vsyncpa [#allocation6], 1 }
 0x1f8   :  { %877 = vsyncpa [#allocation6 + $0x1], 1 }
 0x1f9   :  { %878 = vsyncpa [#allocation4], 1 }
 0x1fa   :  { %880 = vsyncpa [#allocation4 + $0x1], 1 }

</bundles_post_ra>
